<compile_context>
chip_gen: v7x
topology: tpu7x:2x2x1
jax: 0.10.0
libtpu: 0.0.40
codegen_flags: <defaults>
</compile_context>

<pallas_src>
import functools
import math

import jax
import jax.numpy as jnp
from jax.experimental import pallas as pl
from jax.experimental.pallas import tpu as pltpu


# ----------------------------------------------------------------------------
# Activation helper (shared by kernel and reference)
# ----------------------------------------------------------------------------
def _apply_activation(h, activation):
    if activation == "relu":
        return jnp.maximum(h, 0.0)
    if activation == "elu":
        # ELU(alpha=1): x if x > 0 else exp(x) - 1.  Clamp the exp argument so
        # the (discarded) positive branch does not overflow.
        return jnp.where(h > 0.0, h, jnp.exp(jnp.minimum(h, 0.0)) - 1.0)
    if activation == "tanh":
        return jnp.tanh(h)
    if activation == "sigmoid":
        return jax.nn.sigmoid(h)
    return h  # no / unknown activation -> identity (matches nn.Sequential)


def _round_up(v, m):
    return ((v + m - 1) // m) * m


# ----------------------------------------------------------------------------
# Kernel: fused MLP over one batch tile
# ----------------------------------------------------------------------------
def mlp_kernel(x_ref, w_ref, b_ref, out_ref, *, activations, compute_dtype):
    """refs:
      x_ref   : (TILE_B, D)            compute_dtype   (pipelined over batch)
      w_ref   : (n_layers, D, D)       compute_dtype   (resident)
      b_ref   : (n_layers, D)          float32         (resident)
      out_ref : (TILE_B, D)            float32
    """
    n_layers = len(activations)
    h = x_ref[...]                                     # (TILE_B, D)
    for i in range(n_layers):                          # static unroll
        w = w_ref[i]                                   # (D, D) resident slab
        acc = jnp.dot(h, w, preferred_element_type=jnp.float32)
        acc = acc + b_ref[i:i + 1, :]                  # (1, D) row, broadcast
        # TODO(synk): Dropout (p=0.2) is stochastic in train mode; treated as
        # identity here (eval-mode semantics).
        acc = _apply_activation(acc, activations[i])   # f32 elementwise
        if i + 1 < n_layers:
            h = acc.astype(compute_dtype)              # bf16 operand for MXU
        else:
            h = acc                                    # keep final layer f32
    out_ref[...] = h.astype(out_ref.dtype)


# ----------------------------------------------------------------------------
# One-time parameter preprocessing (hoisted out of the forward path)
# ----------------------------------------------------------------------------
def prepare_params(params, compute_dtype=jnp.bfloat16):
    """params: list of (W (in,out) f32, b (out,) f32).

    Returns a single zero-padded weight stack (n_layers, D, D) in compute
    dtype and a bias table (n_layers, D) in f32, with D = all feature dims
    rounded up to a common multiple of 128 (lane axis).
    """
    n_layers = len(params)
    dims = []
    for w, _ in params:
        dims.extend(w.shape)
    D = _round_up(max(dims), 128)

    w_stack = jnp.zeros((n_layers, D, D), compute_dtype)
    biases = jnp.zeros((n_layers, D), jnp.float32)
    for i, (w, b) in enumerate(params):
        di, do = w.shape
        w_stack = w_stack.at[i, :di, :do].set(w.astype(compute_dtype))
        biases = biases.at[i, :do].set(b.astype(jnp.float32))
    return w_stack, biases


# ----------------------------------------------------------------------------
# Jitted forward wrapper
# ----------------------------------------------------------------------------
@functools.partial(
    jax.jit,
    static_argnames=("activations", "out_dim", "compute_dtype", "tile_b_max"))
def mlp_forward(x, w_stack, biases, *, activations, out_dim,
                compute_dtype=jnp.bfloat16, tile_b_max=512):
    """x: (B, in_dim) f32; w_stack/biases from prepare_params()."""
    n_layers, D, _ = w_stack.shape
    assert len(activations) == n_layers
    batch, in_dim = x.shape
    itemsize_c = jnp.dtype(compute_dtype).itemsize

    # ---- batch tiling: >=2 grid programs when the batch allows it (so the
    # "parallel" grid axis can shard across v7x's two TensorCores); big tiles
    # for large batches on single-TC v5e/v6e.
    b8 = _round_up(batch, 8)
    num_tiles_target = 2 if b8 >= 16 else 1
    tile_b = min(tile_b_max, _round_up(-(-b8 // num_tiles_target), 8))
    b_padded = _round_up(b8, tile_b)
    grid = (b_padded // tile_b,)

    # ---- pad/cast the activations (only per-call data movement)
    x_p = jnp.zeros((b_padded, D), compute_dtype)
    x_p = x_p.at[:batch, :in_dim].set(x.astype(compute_dtype))

    # ---- block specs: pipelined x/out tiles, resident weight stack + biases
    in_specs = [
        pl.BlockSpec((tile_b, D), lambda i: (i, 0)),
        pl.BlockSpec((n_layers, D, D), lambda i: (0, 0, 0)),
        pl.BlockSpec((n_layers, D), lambda i: (0, 0)),
    ]
    out_spec = pl.BlockSpec((tile_b, D), lambda i: (i, 0))

    # ---- explicit VMEM budget (cap 40 MiB: safe under v7x's 64 MiB physical)
    weight_bytes = n_layers * D * D * itemsize_c
    bias_bytes = n_layers * D * 4
    io_bytes = 2 * tile_b * D * (itemsize_c + 4)      # double-buffered x/out
    scratch_bytes = 4 * tile_b * D * 4                # intermediate f32 slabs
    vmem_limit = int(min(
        max(2 * (weight_bytes + bias_bytes) + io_bytes + scratch_bytes,
            16 * 1024 * 1024),
        40 * 1024 * 1024))

    kernel = functools.partial(mlp_kernel,
                               activations=tuple(activations),
                               compute_dtype=compute_dtype)

    out_padded = pl.pallas_call(
        kernel,
        out_shape=jax.ShapeDtypeStruct((b_padded, D), jnp.float32),
        grid=grid,
        in_specs=in_specs,
        out_specs=out_spec,
        compiler_params=pltpu.CompilerParams(
            dimension_semantics=("parallel",),   # batch tiles across TCs
            vmem_limit_bytes=vmem_limit),
    )(x_p, w_stack, biases)

    # slice away batch / lane padding (kept lane-dense inside the kernel)
    return out_padded[:batch, :out_dim]


# ----------------------------------------------------------------------------
# Pure-JAX reference emulating the kernel's precision (bf16 operands, f32 acc)
# ----------------------------------------------------------------------------
def reference_forward(x, params, activations, compute_dtype=jnp.bfloat16):
    n = len(params)
    h = x.astype(compute_dtype)
    for i, ((w, b), act) in enumerate(zip(params, activations)):
        z = jnp.dot(h, w.astype(compute_dtype),
                    preferred_element_type=jnp.float32) + b
        z = _apply_activation(z, act)
        h = z.astype(compute_dtype) if i + 1 < n else z
    return h


# ----------------------------------------------------------------------------
# Deterministic parameter init (mirrors nn.Linear default: U(-1/sqrt(in), +))
# ----------------------------------------------------------------------------
def init_linear(key, in_dim, out_dim):
    kw, kb = jax.random.split(key)
    bound = 1.0 / math.sqrt(in_dim)
    # PyTorch stores W as (out, in); transpose to (in, out) for the kernel.
    w = jax.random.uniform(kw, (out_dim, in_dim), jnp.float32, -bound, bound)
    b = jax.random.uniform(kb, (out_dim,), jnp.float32, -bound, bound)
    return w.T, b


def build_network(key, fc_config):
    params = []
    activations = []
    keys = jax.random.split(key, len(fc_config))
    for k, layer in zip(keys, fc_config):
        in_dim, out_dim = layer["dim"]
        params.append(init_linear(k, in_dim, out_dim))
        activations.append(layer["activation"])
    return params, activations


# ----------------------------------------------------------------------------
# Main
# ----------------------------------------------------------------------------
if __name__ == "__main__":
    # Small DQN-style config: state_dim=16 -> 32 -> 32 -> n_actions=4
    fc_config = [
        {"dim": (16, 32), "dropout": False, "activation": "relu"},
        {"dim": (32, 32), "dropout": False, "activation": "elu"},
        {"dim": (32, 4), "dropout": False, "activation": "none"},
    ]

    key = jax.random.PRNGKey(0)
    k_params, k_x = jax.random.split(key)
    params, activations = build_network(k_params, fc_config)
    out_dim = fc_config[-1]["dim"][1]

    # One-time parameter preprocessing (pad to lane grid, cast, stack).
    w_stack, biases = prepare_params(params)
    w_stack, biases = jax.block_until_ready((w_stack, biases))

    batch = 32  # a small replay-batch worth of states per call
    x = jax.random.normal(k_x, (batch, fc_config[0]["dim"][0]), jnp.float32)

    out = mlp_forward(x, w_stack, biases,
                      activations=tuple(activations), out_dim=out_dim)
    out = jax.block_until_ready(out)

    ref = reference_forward(x, params, activations)
    assert out.shape == (batch, out_dim)
    assert jnp.allclose(out, ref, atol=1e-3, rtol=1e-3), (
        float(jnp.max(jnp.abs(out - ref))))

    print("KERNEL_OK")
</pallas_src>

<mosaic_0001>
module attributes {stable_mosaic.version = 11 : i64} {
  func.func @mlp_kernel(%arg0: i32, %arg1: memref<16x128xbf16, #tpu.memory_space<vmem>>, %arg2: memref<3x128x128xbf16, #tpu.memory_space<vmem>>, %arg3: memref<3x128xf32, #tpu.memory_space<vmem>>, %arg4: memref<16x128xf32, #tpu.memory_space<vmem>>) attributes {dimension_semantics = [#tpu.dimension_semantics<parallel>], iteration_bounds = array<i64: 2>, scalar_prefetch = 0 : i64, scratch_operands = 0 : i64, tpu.core_type = #tpu.core_type<tc>, window_params = [{transform_indices = @transform_0, window_bounds = array<i64: 16, 128>}, {pipeline_mode = #tpu.pipeline_mode<synchronous>, transform_indices = @transform_1, window_bounds = array<i64: 3, 128, 128>}, {pipeline_mode = #tpu.pipeline_mode<synchronous>, transform_indices = @transform_2, window_bounds = array<i64: 3, 128>}, {transform_indices = @transform_3, window_bounds = array<i64: 16, 128>}]} {
    %c0 = arith.constant 0 : index
    %c0_0 = arith.constant 0 : index
    %0 = vector.load %arg1[%c0, %c0_0] : memref<16x128xbf16, #tpu.memory_space<vmem>>, vector<16x128xbf16>
    %c0_1 = arith.constant 0 : index
    %c0_2 = arith.constant 0 : index
    %c0_3 = arith.constant 0 : index
    %1 = vector.load %arg2[%c0_1, %c0_2, %c0_3] : memref<3x128x128xbf16, #tpu.memory_space<vmem>>, vector<1x128x128xbf16>
    %2 = vector.shape_cast %1 : vector<1x128x128xbf16> to vector<128x128xbf16>
    %cst = arith.constant dense<0.000000e+00> : vector<16x128xf32>
    %3 = tpu.matmul %0, %2, %cst {dimension_numbers = #tpu.dot_dimension_numbers<[1], [0], [0], [1], [0, 0, 1, 1], [], []>} : vector<16x128xbf16>, vector<128x128xbf16>, vector<16x128xf32> -> vector<16x128xf32>
    %c0_4 = arith.constant 0 : index
    %c0_5 = arith.constant 0 : index
    %4 = vector.load %arg3[%c0_4, %c0_5] : memref<3x128xf32, #tpu.memory_space<vmem>>, vector<1x128xf32>
    %5 = vector.broadcast %4 : vector<1x128xf32> to vector<16x128xf32>
    %6 = arith.addf %3, %5 : vector<16x128xf32>
    %cst_6 = arith.constant 0.000000e+00 : f32
    %7 = vector.broadcast %cst_6 : f32 to vector<16x128xf32>
    %8 = arith.maximumf %6, %7 : vector<16x128xf32>
    %9 = arith.truncf %8 : vector<16x128xf32> to vector<16x128xbf16>
    %c1 = arith.constant 1 : index
    %c0_7 = arith.constant 0 : index
    %c0_8 = arith.constant 0 : index
    %10 = vector.load %arg2[%c1, %c0_7, %c0_8] : memref<3x128x128xbf16, #tpu.memory_space<vmem>>, vector<1x128x128xbf16>
    %11 = vector.shape_cast %10 : vector<1x128x128xbf16> to vector<128x128xbf16>
    %cst_9 = arith.constant dense<0.000000e+00> : vector<16x128xf32>
    %12 = tpu.matmul %9, %11, %cst_9 {dimension_numbers = #tpu.dot_dimension_numbers<[1], [0], [0], [1], [0, 0, 1, 1], [], []>} : vector<16x128xbf16>, vector<128x128xbf16>, vector<16x128xf32> -> vector<16x128xf32>
    %c1_10 = arith.constant 1 : index
    %c0_11 = arith.constant 0 : index
    %13 = vector.load %arg3[%c1_10, %c0_11] : memref<3x128xf32, #tpu.memory_space<vmem>>, vector<1x128xf32>
    %14 = vector.broadcast %13 : vector<1x128xf32> to vector<16x128xf32>
    %15 = arith.addf %12, %14 : vector<16x128xf32>
    %cst_12 = arith.constant 0.000000e+00 : f32
    %16 = vector.broadcast %cst_12 : f32 to vector<16x128xf32>
    %17 = arith.cmpf ogt, %15, %16 : vector<16x128xf32>
    %cst_13 = arith.constant 0.000000e+00 : f32
    %18 = vector.broadcast %cst_13 : f32 to vector<16x128xf32>
    %19 = arith.minimumf %15, %18 : vector<16x128xf32>
    %20 = math.exp %19 : vector<16x128xf32>
    %cst_14 = arith.constant 1.000000e+00 : f32
    %21 = vector.broadcast %cst_14 : f32 to vector<16x128xf32>
    %22 = arith.subf %20, %21 : vector<16x128xf32>
    %23 = arith.select %17, %15, %22 : vector<16x128xi1>, vector<16x128xf32>
    %24 = arith.truncf %23 : vector<16x128xf32> to vector<16x128xbf16>
    %c2 = arith.constant 2 : index
    %c0_15 = arith.constant 0 : index
    %c0_16 = arith.constant 0 : index
    %25 = vector.load %arg2[%c2, %c0_15, %c0_16] : memref<3x128x128xbf16, #tpu.memory_space<vmem>>, vector<1x128x128xbf16>
    %26 = vector.shape_cast %25 : vector<1x128x128xbf16> to vector<128x128xbf16>
    %cst_17 = arith.constant dense<0.000000e+00> : vector<16x128xf32>
    %27 = tpu.matmul %24, %26, %cst_17 {dimension_numbers = #tpu.dot_dimension_numbers<[1], [0], [0], [1], [0, 0, 1, 1], [], []>} : vector<16x128xbf16>, vector<128x128xbf16>, vector<16x128xf32> -> vector<16x128xf32>
    %c2_18 = arith.constant 2 : index
    %c0_19 = arith.constant 0 : index
    %28 = vector.load %arg3[%c2_18, %c0_19] : memref<3x128xf32, #tpu.memory_space<vmem>>, vector<1x128xf32>
    %29 = vector.broadcast %28 : vector<1x128xf32> to vector<16x128xf32>
    %30 = arith.addf %27, %29 : vector<16x128xf32>
    %c0_20 = arith.constant 0 : index
    %c0_21 = arith.constant 0 : index
    %31 = vector.load %arg4[%c0_20, %c0_21] : memref<16x128xf32, #tpu.memory_space<vmem>>, vector<16x128xf32>
    tpu.vector_store %arg4[%c0_20, %c0_21], %30 {strides = array<i32>} : memref<16x128xf32, #tpu.memory_space<vmem>>, vector<16x128xf32>,
    return
  }
  func.func @transform_0(%arg0: i32) -> (i32, i32) {
    %c0_i32 = arith.constant 0 : i32
    %c0_i32_0 = arith.constant 0 : i32
    return %arg0, %c0_i32 : i32, i32
  }
  func.func @transform_1(%arg0: i32) -> (i32, i32, i32) {
    %c0_i32 = arith.constant 0 : i32
    %c0_i32_0 = arith.constant 0 : i32
    %c0_i32_1 = arith.constant 0 : i32
    %c0_i32_2 = arith.constant 0 : i32
    return %c0_i32, %c0_i32_0, %c0_i32_1 : i32, i32, i32
  }
  func.func @transform_2(%arg0: i32) -> (i32, i32) {
    %c0_i32 = arith.constant 0 : i32
    %c0_i32_0 = arith.constant 0 : i32
    %c0_i32_1 = arith.constant 0 : i32
    return %c0_i32, %c0_i32_0 : i32, i32
  }
  func.func @transform_3(%arg0: i32) -> (i32, i32) {
    %c0_i32 = arith.constant 0 : i32
    %c0_i32_0 = arith.constant 0 : i32
    return %arg0, %c0_i32 : i32, i32
  }
}

</mosaic_0001>

<bundles_post_ra>
// kernel: mlp_forward.1
= control target key start
LH: loop header
LB: loop body
LE: loop exit
PB: predicated region body
PF: predicated region fallthrough
CT: control target
= control target key end

     0   :  { %8 = vsyncpa [#allocation3], 0  ;;  %s863_s12 = smov 0   ;;  %s968_s0 = inlined_call_operand.vmem [shape: bf16[32,128], index: 0, kind: input, shape index: {}]   ;;  %s969_s1 = inlined_call_operand.hbm [shape: bf16[3,128,128], index: 1, kind: input, shape index: {}]   ;;  %s970_s2 = inlined_call_operand.vmem [shape: f32[3,128], index: 2, kind: input, shape index: {}]   ;;  %s971_s3 = inlined_call_operand.vmem [shape: f32[32,128], index: 3, kind: output, shape index: {}]  }
   0x1 LB: > { %s616_s13 = sadd.s32 4294967295, %s836_s12   ;;  %p618_p0 = scmp.ge.s32.totalorder %s836_s12, 1  ;;  %s836_s12 = sphi %s863_s12, %s14_s12  }
   0x2   : > { %p113_p1 = scmp.lt.s32.totalorder %s836_s12, 3  ;;  %s838_s14 = smov [#allocation2]  }
   0x3   : > { %s125_s15 = sshll.u32 %s838_s14, 4  ;;  %p877_p3 = scmp.eq.s32.totalorder %s616_s13, 0  ;;  %s126_s15 = int_to_ptr.vmem [resolvable:$true] %s125_s15 }
   0x4   : > { %p871_p2 = pnand %p618_p0, %p113_p1  ;;  %s798_s21 = scalar_lea.hbm %s969_s1, 3072 }
   0x5   : > { %s976_s17 = scalar_select %p877_p3, 1, 0 }
   0x6   : > { %s975_s16 = scalar_select %p871_p2, 1, 0 }
   0x7   : > { %p750_p4 = pneg %p871_p2  ;;  %p799_p6 = scmp.ne.s32.totalorder %s969_s1, %s798_s21 }
   0x8   : > { %p805_p10 = scmp.lt.u32.totalorder %s798_s21, %s969_s1 }
   0x9   : > { %p885_p5 = pnand %p877_p3, %p750_p4 }
   0xb   : > { %p800_p7 = pneg %p885_p5 }
   0xd   : > { %p801_p8 = pnand %p800_p7, %p799_p6 }
   0xf   : > { %p802_p9 = pneg %p801_p8 }
  0x11   : > { %p807_p11 = pnand %p805_p10, %p802_p9 }
  0x13   : > { %810 = shalt.err (!%p807_p11)
}
  0x14   : > { %s811_s26 = scalar_lea.vmem %s126_s15, 3072  ;;  %p819_p1 = scmp.lt.s32.totalorder %s126_s15, %s126_s15 }
  0x15   : > { %p812_p12 = scmp.ne.s32.totalorder %s126_s15, %s811_s26  ;;  %p820_p4 = scmp.lt.s32.totalorder %s811_s26, %s811_s26 }
  0x17   : > { %p814_p13 = pnand %p812_p12, %p800_p7  ;;  %p821_p3 = por %p820_p4, %p819_p1 }
  0x19   : > { %p815_p0 = pneg %p814_p13 }
  0x1b   : > { %p822_p2 = pnand %p821_p3, %p815_p0 }
  0x1d   : > { %825 = shalt.err (!%p822_p2)
}
  0x1e   : > { %s839_s27 = smov 64   ;;  %s840_s28 = smov 4  }
  0x1f   : > { %753 = dma.hbm_to_vmem [thread:$0]  (!%p885_p5), %s969_s1, 3072, %s126_s15, [#allocation3], %s839_s27, %s839_s27, %s840_s28  }
  0x20   : > { %p978_p6 = scmp.ne.s32.totalorder %s975_s16, 0 }
  0x21   : > { %p979_p8 = scmp.ne.s32.totalorder (!%p978_p6), %s976_s17, 0 }
  0x22   : > { %153 = sbr.rel (%p978_p6) target bundleno = 749 (0x2ed), region = 32 }
  0x29   : > { %831 = dma.done.wait (%p979_p8), [#allocation3], 3072  }
  0x2a   : > { %833 = vsyncadd (%p979_p8), [#allocation3], 4294964224  ;;  %s623_s4 = sshll.u32 %s616_s13, 1  ;;  %v841_v0 = vmov 0.0   ;;  %vm842_vm0 = vmmov 0   ;;  %v769_v1 = vld [vmem:[#allocation2] sm:$0xff]  }
  0x2b   : > { %686 = vmatprep.subr.bf16.mxu0 %v841_v0  ;;  %702 = vmatprep.mubr.msk.bf16.mxu0 %vm842_vm0, %v841_v0  ;;  %p178_p2 = scmp.lt.s32.totalorder %s623_s4, 3  ;;  %v770_v2 = vld [vmem:[#allocation2 + $0x8] sm:$0xff]   ;;  %v771_v3 = vld [vmem:[#allocation2 + $0x10] sm:$0xff]   ;;  %v778_v4 = vld [vmem:[#allocation2 + $0x40] sm:$0xff]  }
  0x2c   : > { %706 = vmatprep.subr.bf16.mxu1 %v841_v0  ;;  %722 = vmatprep.mubr.msk.bf16.mxu1 %vm842_vm0, %v841_v0  ;;  %v772_v5 = vld [vmem:[#allocation2 + $0x18] sm:$0xff]   ;;  %v779_v6 = vld [vmem:[#allocation2 + $0x48] sm:$0xff]   ;;  %v773_v7 = vld [vmem:[#allocation2 + $0x20] sm:$0xff]  }
  0x2d   : > { %s981_s4 = smov (!%p178_p2, %s623_s4), 3  ;;  %687 = vmatpush3.bf16.msra.mxu0 %v769_v1  ;;  %707 = vmatpush3.bf16.msra.mxu1 %v778_v4  ;;  %v780_v8 = vld [vmem:[#allocation2 + $0x50] sm:$0xff]   ;;  %v774_v9 = vld [vmem:[#allocation2 + $0x28] sm:$0xff]   ;;  %v781_v10 = vld [vmem:[#allocation2 + $0x58] sm:$0xff]  }
  0x2e   : > { %688 = vmatprep.subr.bf16.mxu0 %v841_v0  ;;  %s624_s5 = sshll.u32 %s981_s4, 2  ;;  %708 = vmatprep.subr.bf16.mxu1 %v841_v0  ;;  %v775_v11 = vld [vmem:[#allocation2 + $0x30] sm:$0xff]   ;;  %v782_v12 = vld [vmem:[#allocation2 + $0x60] sm:$0xff]   ;;  %v776_v13 = vld [vmem:[#allocation2 + $0x38] sm:$0xff]   ;;  %s626_s14 = sshll.u32 %s981_s4, 3 }
  0x2f   : > { %s927_s8 = scalar_lea.vmem %s968_s0, %s624_s5  ;;  %v783_v14 = vld [vmem:[#allocation2 + $0x68] sm:$0xff]   ;;  %v784_v16 = vld [vmem:[#allocation2 + $0x70] sm:$0xff]   ;;  %v785_v17 = vld [vmem:[#allocation2 + $0x78] sm:$0xff]   ;;  %s187_s19 = scalar_lea.vmem %s971_s3, %s626_s14 }
  0x30   : > { %v777_v15 = vld [vmem:[%s927_s8] sm:$0xff]   ;;  %v787_v19 = vld [vmem:[#allocation2 + $0x88] sm:$0xff]   ;;  %v788_v30 = vld [vmem:[#allocation2 + $0x90] sm:$0xff]  }
  0x31   : > { %689 = vmatpush3.bf16.msra.mxu0 %v770_v2  ;;  %709 = vmatpush3.bf16.msra.mxu1 %v779_v6  ;;  %v786_v18 = vld [vmem:[#allocation2 + $0x80] sm:$0xff]   ;;  %v789_v31 = vld [vmem:[#allocation2 + $0x98] sm:$0xff]   ;;  %v791_v33 = vld [vmem:[#allocation2 + $0xa8] sm:$0xff]  }
  0x32   : > { %690 = vmatprep.subr.bf16.mxu0 %v841_v0  ;;  %710 = vmatprep.subr.bf16.mxu1 %v841_v0  ;;  %v627_v20 = vld [vmem:[%s970_s2] ss:$0 sm:$0xff]  ;;  %v792_v34 = vld [vmem:[#allocation2 + $0xb0] sm:$0xff]   ;;  %v793_v35 = vld [vmem:[#allocation2 + $0xb8] sm:$0xff]  }
  0x33   : > { %v790_v32 = vld [vmem:[#allocation2 + $0xa0] sm:$0xff]  }
  0x34   : > { %v637_v36 = vld [vmem:[%s970_s2 + $0x1] ss:$0 sm:$0xff]  ;;  %v648_v54 = vld [vmem:[%s970_s2 + $0x2] ss:$0 sm:$0xff] }
  0x35   : > { %691 = vmatpush3.bf16.msra.mxu0 %v771_v3  ;;  %711 = vmatpush3.bf16.msra.mxu1 %v780_v8 }
  0x36   : > { %692 = vmatprep.subr.bf16.mxu0 %v841_v0  ;;  %712 = vmatprep.subr.bf16.mxu1 %v841_v0 }
  0x39   : > { %693 = vmatpush3.bf16.msra.mxu0 %v772_v5  ;;  %713 = vmatpush3.bf16.msra.mxu1 %v781_v10 }
  0x3a   : > { %694 = vmatprep.subr.bf16.mxu0 %v841_v0  ;;  %714 = vmatprep.subr.bf16.mxu1 %v841_v0 }
  0x3d   : > { %695 = vmatpush3.bf16.msra.mxu0 %v773_v7  ;;  %715 = vmatpush3.bf16.msra.mxu1 %v782_v12 }
  0x3e   : > { %696 = vmatprep.subr.bf16.mxu0 %v841_v0  ;;  %716 = vmatprep.subr.bf16.mxu1 %v841_v0 }
  0x41   : > { %697 = vmatpush3.bf16.msra.mxu0 %v774_v9  ;;  %717 = vmatpush3.bf16.msra.mxu1 %v783_v14 }
  0x42   : > { %698 = vmatprep.subr.bf16.mxu0 %v841_v0  ;;  %718 = vmatprep.subr.bf16.mxu1 %v841_v0 }
  0x45   : > { %699 = vmatpush3.bf16.msra.mxu0 %v775_v11  ;;  %719 = vmatpush3.bf16.msra.mxu1 %v784_v16 }
  0x46   : > { %700 = vmatprep.subr.bf16.mxu0 %v841_v0  ;;  %720 = vmatprep.subr.bf16.mxu1 %v841_v0 }
  0x49   : > { %701 = vmatpush3.bf16.msra.mxu0 %v776_v13  ;;  %721 = vmatpush3.bf16.msra.mxu1 %v785_v17 }
  0x4a   : > { %726 = vmatprep.subr.bf16.mxu0 %v841_v0 }
  0x4c   : > { %703 = vmatmul.mubr.bf16.vlgmr.msra.gmra.mrb[0].mxu0 %v777_v15 }
  0x4d   : > { %742 = vmatprep.mubr.msk.bf16.mxu0 %vm842_vm0, %v841_v0  ;;  %727 = vmatpush3.bf16.msra.mxu0 %v786_v18 }
  0x4e   : > { %728 = vmatprep.subr.bf16.mxu0 %v841_v0 }
  0x51   : > { %729 = vmatpush3.bf16.msra.mxu0 %v787_v19 }
  0x52   : > { %730 = vmatprep.subr.bf16.mxu0 %v841_v0 }
  0x55   : > { %731 = vmatpush3.bf16.msra.mxu0 %v788_v30 }
  0x56   : > { %732 = vmatprep.subr.bf16.mxu0 %v841_v0 }
  0x59   : > { %733 = vmatpush3.bf16.msra.mxu0 %v789_v31 }
  0x5a   : > { %734 = vmatprep.subr.bf16.mxu0 %v841_v0 }
  0x5d   : > { %735 = vmatpush3.bf16.msra.mxu0 %v790_v32 }
  0x5e   : > { %736 = vmatprep.subr.bf16.mxu0 %v841_v0 }
  0x61   : > { %737 = vmatpush3.bf16.msra.mxu0 %v791_v33 }
  0x62   : > { %738 = vmatprep.subr.bf16.mxu0 %v841_v0 }
  0x65   : > { %739 = vmatpush3.bf16.msra.mxu0 %v792_v34 }
  0x66   : > { %740 = vmatprep.subr.bf16.mxu0 %v841_v0 }
  0x69   : > { %741 = vmatpush3.bf16.msra.mxu0 %v793_v35 }
 0x11f   : > { %v301_v21 = vpop.f32.mrb[0].mxu0 }
 0x120   : > { %v302_v22 = vadd.f32 %v627_v20, %v301_v21  ;;  %v704_v23 = vpop.f32.mrb[1].mxu0 }
 0x121   : > { %v304_v24 = vpop.f32.mrb[2].mxu0 }
 0x122   : > { %v305_v25 = vadd.f32 %v627_v20, %v304_v24  ;;  %v705_v26 = vpop.f32.mrb[3].mxu0  ;;  %v308_v27 = vmax.f32 %v302_v22, 0.0 }
 0x124   : > { %v309_v28 = vmax.f32 %v305_v25, 0.0 }
 0x126   : > { %v310_v29 = vpack.c.bf16 %v309_v28, %v308_v27 }
 0x128   : > { %723 = vmatmul.mubr.bf16.vlgmr.msra.gmra.mrb[0].mxu1 %v310_v29 }
 0x1fb   : > { %v415_v37 = vpop.f32.mrb[0].mxu1 }
 0x1fc   : > { %v416_v38 = vadd.f32 %v637_v36, %v415_v37  ;;  %v724_v39 = vpop.f32.mrb[1].mxu1 }
 0x1fd   : > { %v418_v40 = vpop.f32.mrb[2].mxu1 }
 0x1fe   : > { %v424_v41 = vmin.f32 %v416_v38, 0.0  ;;  %v419_v42 = vadd.f32 %v637_v36, %v418_v40  ;;  %v725_v43 = vpop.f32.mrb[3].mxu1  ;;  %vm422_vm1 = vcmp.gt.f32.partialorder %v416_v38, 0.0 }
 0x200   : > { %v426_v44 = vmul.f32 1.442695, %v424_v41  ;;  %v425_v45 = vmin.f32 %v419_v42, 0.0  ;;  %vm423_vm2 = vcmp.gt.f32.partialorder %v419_v42, 0.0 }
 0x202   : > { %794 = vpow2.f32 %v426_v44  ;;  %v428_v46 = vmul.f32 1.442695, %v425_v45 }
 0x204   : > { %796 = vpow2.f32 %v428_v46 }
 0x20c   : > { %v795_v47 = vpop.eup %794 }
 0x20d   : > { %v646_v48 = vadd.f32 -1.0, %v795_v47 }
 0x20e   : > { %v797_v49 = vpop.eup %796 }
 0x20f   : > { %v647_v50 = vadd.f32 -1.0, %v797_v49  ;;  %v432_v51 = vsel %vm422_vm1, %v416_v38, %v646_v48 }
 0x211   : > { %v433_v52 = vsel %vm423_vm2, %v419_v42, %v647_v50 }
 0x212   : > { %v434_v53 = vpack.c.bf16 %v433_v52, %v432_v51 }
 0x214   : > { %743 = vmatmul.mubr.bf16.vlgmr.msra.gmra.mrb[4].mxu0 %v434_v53 }
 0x2e7   : > { %v539_v55 = vpop.f32.mrb[4].mxu0 }
 0x2e8   : > { %v540_v56 = vadd.f32 %v648_v54, %v539_v55  ;;  %v744_v57 = vpop.f32.mrb[5].mxu0 }
 0x2e9   : > { %v542_v58 = vpop.f32.mrb[6].mxu0 }
 0x2ea   : > { %546 = vst [vmem:[%s187_s19] sm:$0xff] %v540_v56  ;;  %v543_v59 = vadd.f32 %v648_v54, %v542_v58  ;;  %v745_v60 = vpop.f32.mrb[7].mxu0 }
 0x2ec   : > { %547 = vst [vmem:[%s187_s19 + $0x8] sm:$0xff] %v543_v59 }
 0x2ed PF: > { %s14_s12 = sadd.s32 1, %s836_s12  }
 0x2ee   : > { %p11_p3 = scmp.ge.s32.totalorder %s14_s12, 4  }
 0x2f0   :  { %13 = sbr.rel (!%p11_p3) target bundleno = 1 (0x1), region = 69 }
 0x2f7   :  { %570 = vsyncpa [#allocation3], 1 }
 0x2f8   :  { %572 = vsyncpa [#allocation3 + $0x1], 1 }

</bundles_post_ra>
